<compile_context>
chip_gen: v7x
topology: tpu7x:2x2x1
jax: 0.10.0
libtpu: 0.0.40
codegen_flags: <defaults>
</compile_context>

<pallas_src>
import functools

import jax
import jax.numpy as jnp
from jax.experimental import pallas as pl
from jax.experimental.pallas import tpu as pltpu

# Batches below this run in a single no-grid kernel (whole problem in VMEM).
_SMALL_BATCH = 1024


def _toy_model_kernel(x_ref, w1_ref, b1_ref, w2_ref, b2_ref, o_ref):
    # net1: x @ W1 + b1, ReLU   (W1 pre-transposed to (in, hid); no in-kernel .T)
    h = jnp.dot(x_ref[...], w1_ref[...],
                preferred_element_type=jnp.float32)            # (TB, hid)
    h = jnp.maximum(h + b1_ref[...], 0.0)                      # bias (1, hid) broadcast
    # net2: h @ W2 + b2         (W2 pre-transposed to (hid, out))
    y = jnp.dot(h, w2_ref[...],
                preferred_element_type=jnp.float32)            # (TB, out)
    o_ref[...] = (y + b2_ref[...]).astype(o_ref.dtype)


def prepare_toy_model_params(w1, b1, w2, b2):
    """One-time kernel-layout prep for PyTorch-style Linear params.

    w1/w2 are (out, in), b1/b2 are (out,).  Done once at init so the per-call
    hot path carries no transpose/reshape HLO ops.
    """
    return (w1.T, b1.reshape(1, -1), w2.T, b2.reshape(1, -1))


def _round_up(x, m):
    return ((x + m - 1) // m) * m


def toy_model_apply(x, params, *, batch_tile=4096):
    """x: (B, in_dim) float32; params from prepare_toy_model_params()."""
    w1t, b1r, w2t, b2r = params
    B, in_dim = x.shape
    hid = w1t.shape[1]
    out_dim = w2t.shape[1]

    if B < _SMALL_BATCH:
        # Tiny-batch path: no grid at all -> no per-step pipeline overhead.
        return pl.pallas_call(
            _toy_model_kernel,
            out_shape=jax.ShapeDtypeStruct((B, out_dim), jnp.float32),
            in_specs=[pl.BlockSpec(memory_space=pltpu.MemorySpace.VMEM)] * 5,
            out_specs=pl.BlockSpec(memory_space=pltpu.MemorySpace.VMEM),
        )(x, w1t, b1r, w2t, b2r)

    # Batch-tiled path.  Keep the tile a multiple of 8 and aim for >= 2 grid
    # steps so the "parallel" batch axis can actually be split across v7x's
    # two TensorCores.
    tile = min(batch_tile, max(8, _round_up(pl.cdiv(B, 2), 8)))
    b_pad = _round_up(B, tile)
    x_in = x if b_pad == B else jnp.pad(x, ((0, b_pad - B), (0, 0)))

    y = pl.pallas_call(
        _toy_model_kernel,
        out_shape=jax.ShapeDtypeStruct((b_pad, out_dim), jnp.float32),
        grid=(b_pad // tile,),
        in_specs=[
            pl.BlockSpec((tile, in_dim), lambda i: (i, 0)),     # activations stream
            pl.BlockSpec((in_dim, hid), lambda i: (0, 0)),      # resident weights
            pl.BlockSpec((1, hid), lambda i: (0, 0)),
            pl.BlockSpec((hid, out_dim), lambda i: (0, 0)),
            pl.BlockSpec((1, out_dim), lambda i: (0, 0)),
        ],
        out_specs=pl.BlockSpec((tile, out_dim), lambda i: (i, 0)),
        compiler_params=pltpu.CompilerParams(
            dimension_semantics=("parallel",),
            # Headroom over v5e's 16 MiB default scoped limit; still well under
            # v7x's 64 MiB physical VMEM.
            vmem_limit_bytes=32 * 1024 * 1024,
        ),
    )(x_in, w1t, b1r, w2t, b2r)

    return y if b_pad == B else y[:B]


def toy_model(x, w1, b1, w2, b2, *, batch_tile=4096):
    """Convenience wrapper taking raw PyTorch-style params (prep not hoisted)."""
    return toy_model_apply(x, prepare_toy_model_params(w1, b1, w2, b2),
                           batch_tile=batch_tile)


def init_linear_params(key, in_features, out_features):
    # Deterministic init mimicking torch.nn.Linear default (uniform +/- 1/sqrt(fan_in)).
    kw, kb = jax.random.split(key)
    bound = 1.0 / jnp.sqrt(jnp.float32(in_features))
    w = jax.random.uniform(kw, (out_features, in_features),
                           dtype=jnp.float32, minval=-bound, maxval=bound)
    b = jax.random.uniform(kb, (out_features,),
                           dtype=jnp.float32, minval=-bound, maxval=bound)
    return w, b


def _reference(x, w1, b1, w2, b2):
    return jnp.maximum(x @ w1.T + b1, 0.0) @ w2.T + b2


if __name__ == "__main__":
    key = jax.random.PRNGKey(0)
    kx, k1, k2, kx2 = jax.random.split(key, 4)

    B, IN, HID, OUT = 8, 10, 10, 5
    x = jax.random.normal(kx, (B, IN), dtype=jnp.float32)
    w1, b1 = init_linear_params(k1, IN, HID)    # net1: Linear(10, 10)
    w2, b2 = init_linear_params(k2, HID, OUT)   # net2: Linear(10, 5)

    # Hoist parameter layout prep out of the per-call hot path.
    params = prepare_toy_model_params(w1, b1, w2, b2)
    apply_fn = jax.jit(functools.partial(toy_model_apply, batch_tile=4096))

    # Tiny-batch (no-grid) path.
    out = apply_fn(x, params)
    jax.block_until_ready(out)
    ref = _reference(x, w1, b1, w2, b2)
    assert out.shape == (B, OUT)
    assert jnp.allclose(out, ref, atol=1e-5, rtol=1e-5)

    # Batch-tiled (parallel-grid) path with a non-multiple batch size to
    # exercise the wrapper-side batch padding.
    B2 = 2050
    x2 = jax.random.normal(kx2, (B2, IN), dtype=jnp.float32)
    out2 = apply_fn(x2, params)
    jax.block_until_ready(out2)
    ref2 = _reference(x2, w1, b1, w2, b2)
    assert out2.shape == (B2, OUT)
    assert jnp.allclose(out2, ref2, atol=1e-5, rtol=1e-5)

    print("KERNEL_OK")
</pallas_src>

<mosaic_0001>
module attributes {stable_mosaic.version = 11 : i64} {
  func.func @_toy_model_kernel(%arg0: memref<8x10xf32, #tpu.memory_space<vmem>>, %arg1: memref<10x10xf32, #tpu.memory_space<vmem>>, %arg2: memref<1x10xf32, #tpu.memory_space<vmem>>, %arg3: memref<10x5xf32, #tpu.memory_space<vmem>>, %arg4: memref<1x5xf32, #tpu.memory_space<vmem>>, %arg5: memref<8x5xf32, #tpu.memory_space<vmem>>) attributes {dimension_semantics = [], scalar_prefetch = 0 : i64, scratch_operands = 0 : i64, tpu.core_type = #tpu.core_type<tc>} {
    %c0 = arith.constant 0 : index
    %c0_0 = arith.constant 0 : index
    %0 = vector.load %arg0[%c0, %c0_0] : memref<8x10xf32, #tpu.memory_space<vmem>>, vector<8x10xf32>
    %c0_1 = arith.constant 0 : index
    %c0_2 = arith.constant 0 : index
    %1 = vector.load %arg1[%c0_1, %c0_2] : memref<10x10xf32, #tpu.memory_space<vmem>>, vector<10x10xf32>
    %cst = arith.constant dense<0.000000e+00> : vector<8x10xf32>
    %2 = tpu.matmul %0, %1, %cst {dimension_numbers = #tpu.dot_dimension_numbers<[1], [0], [0], [1], [0, 0, 1, 1], [], []>} : vector<8x10xf32>, vector<10x10xf32>, vector<8x10xf32> -> vector<8x10xf32>
    %c0_3 = arith.constant 0 : index
    %c0_4 = arith.constant 0 : index
    %3 = vector.load %arg2[%c0_3, %c0_4] : memref<1x10xf32, #tpu.memory_space<vmem>>, vector<1x10xf32>
    %4 = vector.broadcast %3 : vector<1x10xf32> to vector<8x10xf32>
    %5 = arith.addf %2, %4 : vector<8x10xf32>
    %cst_5 = arith.constant 0.000000e+00 : f32
    %6 = vector.broadcast %cst_5 : f32 to vector<8x10xf32>
    %7 = arith.maximumf %5, %6 : vector<8x10xf32>
    %c0_6 = arith.constant 0 : index
    %c0_7 = arith.constant 0 : index
    %8 = vector.load %arg3[%c0_6, %c0_7] : memref<10x5xf32, #tpu.memory_space<vmem>>, vector<10x5xf32>
    %cst_8 = arith.constant dense<0.000000e+00> : vector<8x5xf32>
    %9 = tpu.matmul %7, %8, %cst_8 {dimension_numbers = #tpu.dot_dimension_numbers<[1], [0], [0], [1], [0, 0, 1, 1], [], []>} : vector<8x10xf32>, vector<10x5xf32>, vector<8x5xf32> -> vector<8x5xf32>
    %c0_9 = arith.constant 0 : index
    %c0_10 = arith.constant 0 : index
    %10 = vector.load %arg4[%c0_9, %c0_10] : memref<1x5xf32, #tpu.memory_space<vmem>>, vector<1x5xf32>
    %11 = vector.broadcast %10 : vector<1x5xf32> to vector<8x5xf32>
    %12 = arith.addf %9, %11 : vector<8x5xf32>
    %c0_11 = arith.constant 0 : index
    %c0_12 = arith.constant 0 : index
    %13 = vector.load %arg5[%c0_11, %c0_12] : memref<8x5xf32, #tpu.memory_space<vmem>>, vector<8x5xf32>
    tpu.vector_store %arg5[%c0_11, %c0_12], %12 {strides = array<i32>} : memref<8x5xf32, #tpu.memory_space<vmem>>, vector<8x5xf32>,
    return
  }
}

</mosaic_0001>

<bundles_post_ra>
// kernel: toy_model_apply.1
= control target key start
LH: loop header
LB: loop body
LE: loop exit
PB: predicated region body
PF: predicated region fallthrough
CT: control target
= control target key end

     0   :  { %vm35_vm0 = vcmask 1041408   ;;  %v274_v2 = vmov 0.0|0.0   ;;  %vm275_vm1 = vmmov 1   ;;  %vm276_vm3 = vmmov 0   ;;  %s342_s0 = inlined_call_operand.vmem [shape: f32[8,10], index: 0, kind: input, shape index: {}]   ;;  %s343_s1 = inlined_call_operand.vmem [shape: f32[10,10], index: 1, kind: input, shape index: {}]   ;;  %s344_s2 = inlined_call_operand.vmem [shape: f32[1,10], index: 2, kind: input, shape index: {}]   ;;  %s345_s3 = inlined_call_operand.vmem [shape: f32[10,5], index: 3, kind: input, shape index: {}]   ;;  %s346_s4 = inlined_call_operand.vmem [shape: f32[1,5], index: 4, kind: input, shape index: {}]   ;;  %s347_s5 = inlined_call_operand.hbm [shape: f32[8,5], index: 5, kind: output, shape index: {}]  }
   0x1   :  { %v22_v0 = vld [vmem:[%s343_s1] sm:$0xff]  ;;  %v23_v1 = vld [vmem:[%s343_s1 + $0x8] sm:$0x3]  ;;  %237 = vmatprep.subr.bf16.mxu0 %v274_v2  ;;  %vm239_vm2 = vmpackc.low %vm35_vm0, %vm275_vm1  ;;  %241 = vmatprep.subr.bf16.mxu1 %v274_v2  ;;  %v277_v4 = vmov 0.0  }
   0x2   :  { %v238_v3 = vpack.c.bf16 %v23_v1, %v22_v0  ;;  %227 = vmatprep.mubr.msk.f32.mxu0 %vm276_vm3, %v277_v4  ;;  %234 = vmatprep.mubr.msk.f32.mxu1 %vm276_vm3, %v277_v4 }
   0x3   :  { %10 = vsyncpa [#allocation3], 0  ;;  %v21_v5 = vld [vmem:[%s342_s0] sm:$0xff]  ;;  %vm31_vm4 = vcmask 80896   ;;  %v111_v7 = vld [vmem:[%s345_s3 + $0x8] sm:$0x3] }
   0x4   :  { %240 = vmatpush3.bf16.msk.msra.mxu0 %vm239_vm2, %v238_v3  ;;  %v110_v6 = vld [vmem:[%s345_s3] sm:$0xff]  ;;  %s278_s30 = smov [#allocation2]   ;;  %vm195_vm5 = vcmask 39936  }
   0x5   :  { %v242_v8 = vpack.c.bf16 %v111_v7, %v110_v6  ;;  %v211_v9 = vld [vmem:[%s344_s2] ss:$0 sm:$0xff]  ;;  %s203_s6 = sshll.u32 %s278_s30, 4  ;;  %s204_s6 = int_to_ptr.vmem [resolvable:$true] %s203_s6 }
   0x6   :  { %v214_v14 = vld [vmem:[%s346_s4] ss:$0 sm:$0xff]  ;;  %s250_s3 = scalar_lea.vmem %s204_s6, 128  ;;  %p255_p1 = scmp.lt.s32.totalorder %s204_s6, %s204_s6 }
   0x7   :  { %228 = vmatmul.mubr.msk.f32.vlgmr.msra.gmra.mrb[0].mxu0 %vm31_vm4, %v21_v5  ;;  %244 = vmatpush3.bf16.msk.msra.mxu1 %vm239_vm2, %v242_v8  ;;  %p251_p0 = scmp.ne.s32.totalorder %s204_s6, %s250_s3  ;;  %p256_p2 = scmp.lt.s32.totalorder %s250_s3, %s250_s3 }
   0x9   :  { %p257_p3 = por %p256_p2, %p255_p1 }
   0xb   :  { %p258_p4 = pnand %p257_p3, %p251_p0 }
  0xda   :  { %v105_v10 = vpop.f32.mrb[0].mxu0 }
  0xdb   :  { %v106_v11 = vadd.f32 %v211_v9, %v105_v10  ;;  %v229_v12 = vpop.f32.mrb[1].mxu0 }
  0xdd   :  { %v109_v13 = vmax.f32 %v106_v11, 0.0 }
  0xdf   :  { %235 = vmatmul.mubr.msk.f32.vlgmr.msra.gmra.mrb[0].mxu1 %vm31_vm4, %v109_v13 }
 0x1b2   :  { %v191_v15 = vpop.f32.mrb[0].mxu1 }
 0x1b3   :  { %v192_v16 = vadd.f32 %v214_v14, %v191_v15  ;;  %v236_v17 = vpop.f32.mrb[1].mxu1 }
 0x1b5   :  { %196 = vst.msk [vmem:[#allocation2] sm:$0xff] %vm195_vm5, %v192_v16 }
 0x1b6   :  { %261 = shalt.err (!%p258_p4)
}
 0x1b7   :  { %s262_s8 = scalar_lea.hbm %s347_s5, 128 }
 0x1b8   :  { %p263_p5 = scmp.ne.s32.totalorder %s347_s5, %s262_s8  ;;  %p266_p6 = scmp.lt.u32.totalorder %s262_s8, %s347_s5 }
 0x1ba   :  { %p268_p7 = pnand %p266_p6, %p263_p5 }
 0x1bc   :  { %271 = shalt.err (!%p268_p7)
}
 0x1bd   :  { %206 = dma.vmem_to_hbm [thread:$0]  %s204_s6, 128, %s347_s5, [#allocation3]  }
 0x1be   :  { %272 = dma.done.wait [#allocation3], 128  }
 0x1bf   :  { %273 = vsyncadd [#allocation3], 4294967168 }
 0x1c0   :  { %210 = vsyncpa [#allocation3], 1 }

</bundles_post_ra>
